<compile_context>
chip_gen: v7x
topology: tpu7x:2x2x1
jax: 0.10.0
libtpu: 0.0.40
codegen_flags: <defaults>
</compile_context>

<pallas_src>
import functools
import math

import jax
import jax.numpy as jnp
from jax import lax
from jax.experimental import pallas as pl
from jax.experimental.pallas import tpu as pltpu

LANE = 128
SUB_M = 256           # epilogue row-chunk size (vreg-pressure bound)


# ---------------------------------------------------------------------------
# Small helpers
# ---------------------------------------------------------------------------

def _round_up(x, m):
    return ((x + m - 1) // m) * m


def _pad2d(a, rows, cols):
    r, c = a.shape
    return jnp.pad(a, ((0, rows - r), (0, cols - c)))


def _pad_bias(b, cols):
    return jnp.pad(b, (0, cols - b.shape[0])).reshape(1, cols)


def _vmem_budget():
    """~75% of physical VMEM (128 MiB on v5e/v6e, 64 MiB on v7x)."""
    try:
        cap = pltpu.get_tpu_info().vmem_capacity_bytes
    except Exception:
        cap = 64 << 20          # conservative (v7x-sized) fallback
    return int(cap) * 3 // 4


def _agg_vmem_bytes(n_pad, h_pad, tm, tk):
    """Worst-case VMEM footprint of one aggregation call."""
    return (2 * tm * tk                      # int8 A blocks, double buffered
            + 2 * n_pad * h_pad * 2          # resident bf16 XW (2 bufs worst case)
            + tm * h_pad * 4                 # f32 accumulator scratch
            + 2 * tm * h_pad * 4             # output blocks
            + 2 * tm * 4                     # dinv blocks
            + 8 * (h_pad * h_pad + 8 * h_pad) * 4)  # small resident weights/bias


def _choose_layout(n, h_pad, budget):
    """Padded node count + (tm, tk) aggregation tiles, generation/budget aware."""
    if n >= 4096:
        base = 512
    elif n >= 1024:
        base = 256
    else:
        base = 128
    n_pad = _round_up(n, base)

    tm = 128
    for cand in (512, 256, 128):
        if cand <= n_pad and n_pad % cand == 0:
            tm = cand
            break

    tk = 128
    for cand in (2048, 1024, 512, 256):
        if cand <= n_pad and n_pad % cand == 0 and \
           _agg_vmem_bytes(n_pad, h_pad, tm, cand) <= budget:
            tk = cand
            break
    # TODO(synk): for extremely large N where the resident XW itself exceeds the
    # VMEM budget, fall back to streaming XW per K tile instead of residency.
    return n_pad, tm, tk


# ---------------------------------------------------------------------------
# Kernel 1: layer-1 projection  XW1 = dinv * (X @ W1)   (bf16 output)
# ---------------------------------------------------------------------------

def _project_kernel(x_ref, w_ref, dinv_ref, o_ref):
    xw = jnp.dot(x_ref[...], w_ref[...], preferred_element_type=jnp.float32)
    o_ref[...] = (xw * dinv_ref[...]).astype(o_ref.dtype)


def project_scaled(x_bf16, w_bf16, dinv, *, vmem_limit):
    n_pad, f_pad = x_bf16.shape
    h_pad = w_bf16.shape[1]
    tm = n_pad if n_pad <= 1024 else math.gcd(n_pad, 1024)
    return pl.pallas_call(
        _project_kernel,
        out_shape=jax.ShapeDtypeStruct((n_pad, h_pad), jnp.bfloat16),
        grid=(n_pad // tm,),
        in_specs=[
            pl.BlockSpec((tm, f_pad), lambda m: (m, 0)),
            pl.BlockSpec((f_pad, h_pad), lambda m: (0, 0)),
            pl.BlockSpec((tm, 1), lambda m: (m, 0)),
        ],
        out_specs=pl.BlockSpec((tm, h_pad), lambda m: (m, 0)),
        compiler_params=pltpu.CompilerParams(
            dimension_semantics=("parallel",),
            vmem_limit_bytes=vmem_limit),
    )(x_bf16, w_bf16, dinv)


# ---------------------------------------------------------------------------
# Kernel 2: layer-1 aggregation  A @ XW1  (int8 A, resident XW1) with fused
#           epilogue   XW2 = dinv * (relu(dinv * acc + b1) @ W2)   (bf16 out)
# ---------------------------------------------------------------------------

def _agg1_kernel(a_ref, xw_ref, dinv_ref, b1_ref, w2_ref, o_ref, acc_ref,
                 *, tk, sub_m):
    k = pl.program_id(1)

    @pl.when(k == 0)
    def _():
        acc_ref[...] = jnp.zeros_like(acc_ref)

    start = pl.multiple_of(k * tk, tk)
    acc_ref[...] += jnp.dot(a_ref[...].astype(jnp.bfloat16),
                            xw_ref[pl.ds(start, tk), :],
                            preferred_element_type=jnp.float32)

    @pl.when(k == pl.num_programs(1) - 1)
    def _():
        n_sub = acc_ref.shape[0] // sub_m

        def body(r, carry):
            off = pl.multiple_of(r * sub_m, sub_m)
            d = dinv_ref[pl.ds(off, sub_m), :]
            h1 = jnp.maximum(acc_ref[pl.ds(off, sub_m), :] * d + b1_ref[...], 0.0)
            xw2 = jnp.dot(h1.astype(jnp.bfloat16), w2_ref[...],
                          preferred_element_type=jnp.float32)
            o_ref[pl.ds(off, sub_m), :] = (xw2 * d).astype(o_ref.dtype)
            return carry

        lax.fori_loop(0, n_sub, body, 0, unroll=True)


def aggregate1(a_int8, xw1, dinv, b1, w2_bf16, *, tm, tk, vmem_limit):
    n_pad, h_pad = xw1.shape
    grid = (n_pad // tm, n_pad // tk)
    kernel = functools.partial(_agg1_kernel, tk=tk, sub_m=min(tm, SUB_M))
    cost = pl.CostEstimate(
        flops=2 * n_pad * n_pad * h_pad + 2 * n_pad * h_pad * h_pad,
        transcendentals=0,
        bytes_accessed=int(a_int8.size) + int(xw1.size) * 2 + n_pad * h_pad * 2)
    return pl.pallas_call(
        kernel,
        out_shape=jax.ShapeDtypeStruct((n_pad, h_pad), jnp.bfloat16),
        grid=grid,
        in_specs=[
            pl.BlockSpec((tm, tk), lambda m, k: (m, k)),
            pl.BlockSpec((n_pad, h_pad), lambda m, k: (0, 0)),   # resident XW
            pl.BlockSpec((tm, 1), lambda m, k: (m, 0)),
            pl.BlockSpec((1, h_pad), lambda m, k: (0, 0)),
            pl.BlockSpec((h_pad, h_pad), lambda m, k: (0, 0)),
        ],
        out_specs=pl.BlockSpec((tm, h_pad), lambda m, k: (m, 0)),
        scratch_shapes=[pltpu.VMEM((tm, h_pad), jnp.float32)],
        compiler_params=pltpu.CompilerParams(
            dimension_semantics=("parallel", "arbitrary"),
            vmem_limit_bytes=vmem_limit),
        cost_estimate=cost,
    )(a_int8, xw1, dinv, b1, w2_bf16)


# ---------------------------------------------------------------------------
# Kernel 3: layer-2 aggregation  A @ XW2  with fused MLP tail
#           out = relu(relu(dinv * acc + b2) @ fc1 + b_fc1) @ fc2 + b_fc2
# ---------------------------------------------------------------------------

def _agg2_kernel(a_ref, xw_ref, dinv_ref, b2_ref, fc1w_ref, fc1b_ref,
                 fc2w_ref, fc2b_ref, o_ref, acc_ref, *, tk, sub_m):
    k = pl.program_id(1)

    @pl.when(k == 0)
    def _():
        acc_ref[...] = jnp.zeros_like(acc_ref)

    start = pl.multiple_of(k * tk, tk)
    acc_ref[...] += jnp.dot(a_ref[...].astype(jnp.bfloat16),
                            xw_ref[pl.ds(start, tk), :],
                            preferred_element_type=jnp.float32)

    @pl.when(k == pl.num_programs(1) - 1)
    def _():
        n_sub = acc_ref.shape[0] // sub_m

        def body(r, carry):
            off = pl.multiple_of(r * sub_m, sub_m)
            d = dinv_ref[pl.ds(off, sub_m), :]
            h2 = jnp.maximum(acc_ref[pl.ds(off, sub_m), :] * d + b2_ref[...], 0.0)
            # F.dropout(..., training=False) -> identity (inference mode).
            h3 = jnp.maximum(
                jnp.dot(h2, fc1w_ref[...], preferred_element_type=jnp.float32)
                + fc1b_ref[...], 0.0)
            out = jnp.dot(h3, fc2w_ref[...], preferred_element_type=jnp.float32)
            out = out + fc2b_ref[...]
            o_ref[pl.ds(off, sub_m), :] = out.astype(o_ref.dtype)
            return carry

        lax.fori_loop(0, n_sub, body, 0, unroll=True)


def aggregate2(a_int8, xw2, dinv, b2, fc1_w, fc1_b, fc2_w, fc2_b,
               *, tm, tk, vmem_limit):
    n_pad, h_pad = xw2.shape
    o_pad = fc2_w.shape[1]
    grid = (n_pad // tm, n_pad // tk)
    kernel = functools.partial(_agg2_kernel, tk=tk, sub_m=min(tm, SUB_M))
    cost = pl.CostEstimate(
        flops=2 * n_pad * n_pad * h_pad,
        transcendentals=0,
        bytes_accessed=int(a_int8.size) + int(xw2.size) * 2 + n_pad * o_pad * 4)
    return pl.pallas_call(
        kernel,
        out_shape=jax.ShapeDtypeStruct((n_pad, o_pad), jnp.float32),
        grid=grid,
        in_specs=[
            pl.BlockSpec((tm, tk), lambda m, k: (m, k)),
            pl.BlockSpec((n_pad, h_pad), lambda m, k: (0, 0)),   # resident XW
            pl.BlockSpec((tm, 1), lambda m, k: (m, 0)),
            pl.BlockSpec((1, h_pad), lambda m, k: (0, 0)),
            pl.BlockSpec(fc1_w.shape, lambda m, k: (0, 0)),
            pl.BlockSpec(fc1_b.shape, lambda m, k: (0, 0)),
            pl.BlockSpec(fc2_w.shape, lambda m, k: (0, 0)),
            pl.BlockSpec(fc2_b.shape, lambda m, k: (0, 0)),
        ],
        out_specs=pl.BlockSpec((tm, o_pad), lambda m, k: (m, 0)),
        scratch_shapes=[pltpu.VMEM((tm, h_pad), jnp.float32)],
        compiler_params=pltpu.CompilerParams(
            dimension_semantics=("parallel", "arbitrary"),
            vmem_limit_bytes=vmem_limit),
        cost_estimate=cost,
    )(a_int8, xw2, dinv, b2, fc1_w, fc1_b, fc2_w, fc2_b)


# ---------------------------------------------------------------------------
# Adjacency: PyG gcn_norm with normalization folded out.
#   A_hat @ X == dinv * (A @ (dinv * X)),   A = {0,1} edges + self loops.
# A is materialized once, directly at padded shape, in int8 (1 byte/elt).
# ---------------------------------------------------------------------------

def build_adjacency(edge_index, num_nodes, n_pad):
    src = edge_index[0]   # source nodes j
    dst = edge_index[1]   # target nodes i
    a = jnp.zeros((n_pad, n_pad), jnp.int8)
    # TODO(synk): duplicate edges accumulate (PyG summing semantics); int8
    # would overflow only past 127 duplicates of the same edge.
    a = a.at[dst, src].add(jnp.ones(src.shape, jnp.int8))
    diag = jnp.arange(num_nodes)
    a = a.at[diag, diag].add(jnp.ones((num_nodes,), jnp.int8))
    # Degrees in O(E) (no N^2 reduction): in-degree + self loop.
    deg = jnp.zeros((num_nodes,), jnp.float32).at[dst].add(1.0) + 1.0
    dinv = 1.0 / jnp.sqrt(deg)
    dinv = jnp.pad(dinv, (0, n_pad - num_nodes)).reshape(n_pad, 1)
    return a, dinv


# ---------------------------------------------------------------------------
# Full GCN forward
# ---------------------------------------------------------------------------

def gcn_forward(params, x, edge_index):
    n, nfeat = x.shape
    nhid = params["gc1_w"].shape[1]
    nhid2 = params["fc1_w"].shape[1]

    f_pad = _round_up(nfeat, LANE)
    h_pad = _round_up(nhid, LANE)
    h2_pad = _round_up(max(nhid2, 1), LANE)
    o_pad = LANE

    budget = _vmem_budget()
    n_pad, tm, tk = _choose_layout(n, h_pad, budget)

    a_int8, dinv = build_adjacency(edge_index, n, n_pad)

    x_bf = _pad2d(x.astype(jnp.float32), n_pad, f_pad).astype(jnp.bfloat16)
    gc1_w = _pad2d(params["gc1_w"], f_pad, h_pad).astype(jnp.bfloat16)
    gc1_b = _pad_bias(params["gc1_b"], h_pad)
    gc2_w = _pad2d(params["gc2_w"], h_pad, h_pad).astype(jnp.bfloat16)
    gc2_b = _pad_bias(params["gc2_b"], h_pad)
    fc1_w = _pad2d(params["fc1_w"], h_pad, h2_pad)
    fc1_b = _pad_bias(params["fc1_b"], h2_pad)
    fc2_w = _pad2d(params["fc2_w"], h2_pad, o_pad)
    fc2_b = _pad_bias(params["fc2_b"], o_pad)

    # Layer 1 projection: dinv * (X @ W1), bf16.
    xw1 = project_scaled(x_bf, gc1_w, dinv, vmem_limit=budget)

    # Layer 1 aggregation with gc2 projection fused into the epilogue:
    #   xw2 = dinv * (relu(dinv * (A @ xw1) + b1) @ W2)           (bf16)
    xw2 = aggregate1(a_int8, xw1, dinv, gc1_b, gc2_w,
                     tm=tm, tk=tk, vmem_limit=budget)

    # Layer 2 aggregation with fused MLP tail:
    #   out = relu(relu(dinv * (A @ xw2) + b2) @ fc1 + b_fc1) @ fc2 + b_fc2
    out_pad = aggregate2(a_int8, xw2, dinv, gc2_b,
                         fc1_w, fc1_b, fc2_w, fc2_b,
                         tm=tm, tk=tk, vmem_limit=budget)

    return out_pad[:n, :1]


def init_params(key, nfeat, nhid):
    ks = jax.random.split(key, 4)

    def glorot(k, shape):
        lim = jnp.sqrt(6.0 / (shape[0] + shape[1]))
        return jax.random.uniform(k, shape, jnp.float32, -lim, lim)

    return {
        "gc1_w": glorot(ks[0], (nfeat, nhid)),
        "gc1_b": jnp.zeros((nhid,), jnp.float32),
        "gc2_w": glorot(ks[1], (nhid, nhid)),
        "gc2_b": jnp.zeros((nhid,), jnp.float32),
        "fc1_w": glorot(ks[2], (nhid, nhid // 2)),
        "fc1_b": jnp.zeros((nhid // 2,), jnp.float32),
        "fc2_w": glorot(ks[3], (nhid // 2, 1)),
        "fc2_b": jnp.zeros((1,), jnp.float32),
    }


# TODO(synk): for genuinely sparse graphs at very large N, a scalar-prefetch
# gather kernel (PrefetchScalarGridSpec over per-row neighbor lists) would
# replace the dense O(N^2) adjacency stream; dense form kept here for exactness.

if __name__ == "__main__":
    N_NODES = 8
    N_EDGES = 16
    NFEAT = 16
    NHID = 32
    # dropout = 0.5 (inference mode -> no-op)

    key = jax.random.PRNGKey(0)
    k_x, k_e, k_p = jax.random.split(key, 3)

    x = jax.random.normal(k_x, (N_NODES, NFEAT), jnp.float32)
    src = jax.random.randint(k_e, (N_EDGES,), 0, N_NODES)
    dst = jnp.roll(src, 3)  # deterministic targets
    edge_index = jnp.concatenate(
        [jnp.stack([src, dst]), jnp.stack([dst, src])], axis=1
    ).astype(jnp.int32)

    params = init_params(k_p, NFEAT, NHID)

    out = gcn_forward(params, x, edge_index)
    out = jax.block_until_ready(out)
    assert out.shape == (N_NODES, 1)
    assert bool(jnp.all(jnp.isfinite(out)))
    print("KERNEL_OK")
</pallas_src>

<mosaic_0001>
module attributes {stable_mosaic.version = 11 : i64} {
  func.func @_project_kernel(%arg0: i32, %arg1: memref<128x128xbf16, #tpu.memory_space<vmem>>, %arg2: memref<128x128xbf16, #tpu.memory_space<vmem>>, %arg3: memref<128x1xf32, #tpu.memory_space<vmem>>, %arg4: memref<128x128xbf16, #tpu.memory_space<vmem>>) attributes {dimension_semantics = [#tpu.dimension_semantics<parallel>], iteration_bounds = array<i64: 1>, scalar_prefetch = 0 : i64, scratch_operands = 0 : i64, tpu.core_type = #tpu.core_type<tc>, window_params = [{transform_indices = @transform_0, window_bounds = array<i64: 128, 128>}, {pipeline_mode = #tpu.pipeline_mode<synchronous>, transform_indices = @transform_1, window_bounds = array<i64: 128, 128>}, {transform_indices = @transform_2, window_bounds = array<i64: 128, 1>}, {transform_indices = @transform_3, window_bounds = array<i64: 128, 128>}]} {
    %c0 = arith.constant 0 : index
    %c0_0 = arith.constant 0 : index
    %0 = vector.load %arg1[%c0, %c0_0] : memref<128x128xbf16, #tpu.memory_space<vmem>>, vector<128x128xbf16>
    %c0_1 = arith.constant 0 : index
    %c0_2 = arith.constant 0 : index
    %1 = vector.load %arg2[%c0_1, %c0_2] : memref<128x128xbf16, #tpu.memory_space<vmem>>, vector<128x128xbf16>
    %cst = arith.constant dense<0.000000e+00> : vector<128x128xf32>
    %2 = tpu.matmul %0, %1, %cst {dimension_numbers = #tpu.dot_dimension_numbers<[1], [0], [0], [1], [0, 0, 1, 1], [], []>} : vector<128x128xbf16>, vector<128x128xbf16>, vector<128x128xf32> -> vector<128x128xf32>
    %c0_3 = arith.constant 0 : index
    %c0_4 = arith.constant 0 : index
    %3 = vector.load %arg3[%c0_3, %c0_4] : memref<128x1xf32, #tpu.memory_space<vmem>>, vector<128x1xf32>
    %4 = vector.broadcast %3 : vector<128x1xf32> to vector<128x128xf32>
    %5 = arith.mulf %2, %4 : vector<128x128xf32>
    %6 = arith.truncf %5 : vector<128x128xf32> to vector<128x128xbf16>
    %c0_5 = arith.constant 0 : index
    %c0_6 = arith.constant 0 : index
    %7 = vector.load %arg4[%c0_5, %c0_6] : memref<128x128xbf16, #tpu.memory_space<vmem>>, vector<128x128xbf16>
    tpu.vector_store %arg4[%c0_5, %c0_6], %6 {strides = array<i32>} : memref<128x128xbf16, #tpu.memory_space<vmem>>, vector<128x128xbf16>,
    return
  }
  func.func @transform_0(%arg0: i32) -> (i32, i32) {
    %c0_i32 = arith.constant 0 : i32
    %c0_i32_0 = arith.constant 0 : i32
    return %arg0, %c0_i32 : i32, i32
  }
  func.func @transform_1(%arg0: i32) -> (i32, i32) {
    %c0_i32 = arith.constant 0 : i32
    %c0_i32_0 = arith.constant 0 : i32
    %c0_i32_1 = arith.constant 0 : i32
    return %c0_i32, %c0_i32_0 : i32, i32
  }
  func.func @transform_2(%arg0: i32) -> (i32, i32) {
    %c0_i32 = arith.constant 0 : i32
    %c0_i32_0 = arith.constant 0 : i32
    return %arg0, %c0_i32 : i32, i32
  }
  func.func @transform_3(%arg0: i32) -> (i32, i32) {
    %c0_i32 = arith.constant 0 : i32
    %c0_i32_0 = arith.constant 0 : i32
    return %arg0, %c0_i32 : i32, i32
  }
}

</mosaic_0001>

<bundles_post_ra>
// kernel: tpu_custom_call.1
= control target key start
LH: loop header
LB: loop body
LE: loop exit
PB: predicated region body
PF: predicated region fallthrough
CT: control target
= control target key end

     0   :  { %v654_v2 = vmov 0   ;;  %s786_s0 = inlined_call_operand.vmem [shape: bf16[128,128], index: 0, kind: input, shape index: {}]   ;;  %s787_s1 = inlined_call_operand.vmem [shape: bf16[128,128], index: 1, kind: input, shape index: {}]   ;;  %s788_s2 = inlined_call_operand.vmem [shape: f32[128,1], index: 2, kind: input, shape index: {}]   ;;  %s789_s3 = inlined_call_operand.hbm [shape: bf16[128,128], index: 3, kind: output, shape index: {}]  }
   0x1   :  { %v614_v0 = vld [vmem:[%s787_s1] sm:$0xff]   ;;  %v615_v1 = vld [vmem:[%s787_s1 + $0x8] sm:$0xff]   ;;  %613 = vset.pattern.permute.xlu1 %v654_v2  ;;  %612 = vset.pattern.permute.xlu0 %v654_v2  ;;  %v616_v3 = vld [vmem:[%s787_s1 + $0x10] sm:$0xff]  }
   0x2   :  { %560 = vmatprep.subr.bf16.mxu0 %v614_v0  ;;  %592 = vmatprep.subr.bf16.mxu1 %v614_v0  ;;  %v617_v4 = vld [vmem:[%s787_s1 + $0x18] sm:$0xff]   ;;  %v622_v5 = vld [vmem:[%s786_s0] sm:$0xff]   ;;  %v619_v8 = vld [vmem:[%s787_s1 + $0x28] sm:$0xff]  }
   0x3   :  { %561 = vmatpush3.bf16.msra.mxu0 %v614_v0  ;;  %600 = vmatpush3.bf16.msra.mxu1 %v614_v0  ;;  %v623_v6 = vld [vmem:[%s786_s0 + $0x20] sm:$0xff]   ;;  %v243_v9 = vld [vmem:[%s788_s2 + $0x10] sm:$0xff]  ;;  %v244_v11 = vld [vmem:[%s788_s2 + $0x18] sm:$0xff] }
   0x4   :  { %562 = vmatprep.subr.bf16.mxu0 %v615_v1  ;;  %593 = vmatprep.subr.bf16.mxu1 %v615_v1  ;;  %v618_v7 = vld [vmem:[%s787_s1 + $0x20] sm:$0xff]   ;;  %v242_v12 = vld [vmem:[%s788_s2 + $0x8] sm:$0xff]  ;;  %v620_v13 = vld [vmem:[%s787_s1 + $0x30] sm:$0xff]  }
   0x5   :  { %576 = vmatprep.mubr.bf16.mxu0 %v622_v5  ;;  %584 = vmatprep.mubr.bf16.mxu1 %v623_v6  ;;  %v241_v10 = vld [vmem:[%s788_s2] sm:$0xff] }
   0x6   :  { %269 = vperm.xlu1 %613, %v243_v9   ;;  %259 = vperm.xlu0 %612, %v241_v10  }
   0x7   :  { %563 = vmatpush3.bf16.msra.mxu0 %v615_v1  ;;  %601 = vmatpush3.bf16.msra.mxu1 %v615_v1 }
   0x8   :  { %564 = vmatprep.subr.bf16.mxu0 %v616_v3  ;;  %594 = vmatprep.subr.bf16.mxu1 %v616_v3 }
   0xa   :  { %274 = vperm.xlu1 %613, %v244_v11   ;;  %264 = vperm.xlu0 %612, %v242_v12  }
   0xb   :  { %565 = vmatpush3.bf16.msra.mxu0 %v616_v3  ;;  %602 = vmatpush3.bf16.msra.mxu1 %v616_v3 }
   0xc   :  { %566 = vmatprep.subr.bf16.mxu0 %v617_v4  ;;  %595 = vmatprep.subr.bf16.mxu1 %v617_v4 }
   0xf   :  { %567 = vmatpush3.bf16.msra.mxu0 %v617_v4  ;;  %603 = vmatpush3.bf16.msra.mxu1 %v617_v4 }
  0x10   :  { %568 = vmatprep.subr.bf16.mxu0 %v618_v7  ;;  %596 = vmatprep.subr.bf16.mxu1 %v618_v7 }
  0x13   :  { %569 = vmatpush3.bf16.msra.mxu0 %v618_v7  ;;  %604 = vmatpush3.bf16.msra.mxu1 %v618_v7 }
  0x14   :  { %570 = vmatprep.subr.bf16.mxu0 %v619_v8  ;;  %597 = vmatprep.subr.bf16.mxu1 %v619_v8 }
  0x15   :  { %8 = vsyncpa [#allocation3], 0  ;;  %v246_v14 = vld [vmem:[%s788_s2 + $0x28] sm:$0xff]  ;;  %v245_v15 = vld [vmem:[%s788_s2 + $0x20] sm:$0xff] }
  0x16   :  { %v621_v16 = vld [vmem:[%s787_s1 + $0x38] sm:$0xff]   ;;  %284 = vperm.xlu1 %613, %v246_v14   ;;  %279 = vperm.xlu0 %612, %v245_v15   ;;  %v247_v18 = vld [vmem:[%s788_s2 + $0x30] sm:$0xff]  ;;  %v624_v19 = vld [vmem:[%s786_s0 + $0x8] sm:$0xff]  }
  0x17   :  { %571 = vmatpush3.bf16.msra.mxu0 %v619_v8  ;;  %605 = vmatpush3.bf16.msra.mxu1 %v619_v8  ;;  %v248_v17 = vld [vmem:[%s788_s2 + $0x38] sm:$0xff]  ;;  %v625_v20 = vld [vmem:[%s786_s0 + $0x28] sm:$0xff]   ;;  %v249_v22 = vld [vmem:[%s788_s2 + $0x40] sm:$0xff] }
  0x18   :  { %572 = vmatprep.subr.bf16.mxu0 %v620_v13  ;;  %598 = vmatprep.subr.bf16.mxu1 %v620_v13  ;;  %v250_v21 = vld [vmem:[%s788_s2 + $0x48] sm:$0xff]  ;;  %v626_v23 = vld [vmem:[%s786_s0 + $0x10] sm:$0xff]   ;;  %v252_v25 = vld [vmem:[%s788_s2 + $0x58] sm:$0xff] }
  0x19   :  { %v627_v24 = vld [vmem:[%s786_s0 + $0x30] sm:$0xff]   ;;  %v628_v27 = vld [vmem:[%s786_s0 + $0x18] sm:$0xff]   ;;  %v254_v29 = vld [vmem:[%s788_s2 + $0x68] sm:$0xff] }
  0x1a   :  { %294 = vperm.xlu1 %613, %v248_v17   ;;  %289 = vperm.xlu0 %612, %v247_v18   ;;  %v251_v26 = vld [vmem:[%s788_s2 + $0x50] sm:$0xff]  ;;  %v629_v28 = vld [vmem:[%s786_s0 + $0x38] sm:$0xff]   ;;  %v253_v30 = vld [vmem:[%s788_s2 + $0x60] sm:$0xff]  ;;  %s655_s0 = smov [#allocation2]  }
  0x1b   :  { %573 = vmatpush3.bf16.msra.mxu0 %v620_v13  ;;  %606 = vmatpush3.bf16.msra.mxu1 %v620_v13  ;;  %v256_v31 = vld [vmem:[%s788_s2 + $0x78] sm:$0xff]  ;;  %v255_v32 = vld [vmem:[%s788_s2 + $0x70] sm:$0xff]  ;;  %s438_s2 = sshll.u32 %s655_s0, 4  ;;  %s439_s2 = int_to_ptr.vmem [resolvable:$true] %s438_s2 }
  0x1c   :  { %574 = vmatprep.subr.bf16.mxu0 %v621_v16  ;;  %599 = vmatprep.subr.bf16.mxu1 %v621_v16  ;;  %s630_s21 = scalar_lea.vmem %s439_s2, 1024  ;;  %p635_p1 = scmp.lt.s32.totalorder %s439_s2, %s439_s2 }
  0x1d   :  { %p631_p0 = scmp.ne.s32.totalorder %s439_s2, %s630_s21  ;;  %p636_p2 = scmp.lt.s32.totalorder %s630_s21, %s630_s21 }
  0x1e   :  { %304 = vperm.xlu1 %613, %v250_v21   ;;  %299 = vperm.xlu0 %612, %v249_v22  }
  0x1f   :  { %575 = vmatpush3.bf16.msra.mxu0 %v621_v16  ;;  %607 = vmatpush3.bf16.msra.mxu1 %v621_v16  ;;  %p637_p3 = por %p636_p2, %p635_p1 }
  0x21   :  { %p638_p4 = pnand %p637_p3, %p631_p0 }
  0x22   :  { %577 = vmatmul.mubr.bf16.vlgmr.msra.gmra.mrb[0].mxu0 %v624_v19  ;;  %585 = vmatmul.mubr.bf16.vlgmr.msra.gmra.mrb[0].mxu1 %v625_v20 }
  0x23   :  { %580 = vmatprep.mubr.bf16.mxu0 %v626_v23  ;;  %588 = vmatprep.mubr.bf16.mxu1 %v627_v24 }
  0x24   :  { %314 = vperm.xlu1 %613, %v252_v25   ;;  %309 = vperm.xlu0 %612, %v251_v26  }
  0x28   :  { %324 = vperm.xlu1 %613, %v254_v29   ;;  %319 = vperm.xlu0 %612, %v253_v30  }
  0x2a   :  { %581 = vmatmul.mubr.bf16.gmra.mrb[4].mxu0 %v628_v27  ;;  %589 = vmatmul.mubr.bf16.gmra.mrb[4].mxu1 %v629_v28 }
  0x2c   :  { %334 = vperm.xlu1 %613, %v256_v31   ;;  %329 = vperm.xlu0 %612, %v255_v32  }
  0x85   :  { %v270_v33 = vpop.permute.xlu1 %269  ;;  %v260_v34 = vpop.permute.xlu0 %259 }
  0x89   :  { %v275_v35 = vpop.permute.xlu1 %274  ;;  %v265_v36 = vpop.permute.xlu0 %264 }
  0x95   :  { %v285_v37 = vpop.permute.xlu1 %284  ;;  %v280_v38 = vpop.permute.xlu0 %279 }
  0x99   :  { %v295_v39 = vpop.permute.xlu1 %294  ;;  %v290_v40 = vpop.permute.xlu0 %289 }
  0x9d   :  { %v305_v41 = vpop.permute.xlu1 %304  ;;  %v300_v42 = vpop.permute.xlu0 %299 }
  0xa3   :  { %v315_v43 = vpop.permute.xlu1 %314  ;;  %v310_v44 = vpop.permute.xlu0 %309 }
  0xa7   :  { %v325_v45 = vpop.permute.xlu1 %324  ;;  %v320_v46 = vpop.permute.xlu0 %319 }
  0xab   :  { %v335_v3 = vpop.permute.xlu1 %334  ;;  %v330_v4 = vpop.permute.xlu0 %329 }
  0xf5   :  { %v578_v47 = vpop.f32.mrb[0].mxu0  ;;  %v586_v48 = vpop.f32.mrb[0].mxu1 }
  0xf6   :  { %v178_v49 = vpop.f32.mrb[1].mxu0  ;;  %v210_v50 = vpop.f32.mrb[1].mxu1  ;;  %v339_v53 = vmul.f32 %v578_v47, %v270_v33  ;;  %v347_v54 = vmul.f32 %v586_v48, %v310_v44 }
  0xf7   :  { %v579_v51 = vpop.f32.mrb[2].mxu0  ;;  %v587_v52 = vpop.f32.mrb[2].mxu1  ;;  %v337_v59 = vmul.f32 %v260_v34, %v178_v49  ;;  %v345_v60 = vmul.f32 %v300_v42, %v210_v50 }
  0xf8   :  { %v340_v55 = vmul.f32 %v579_v51, %v275_v35  ;;  %v348_v56 = vmul.f32 %v587_v52, %v315_v43  ;;  %v181_v57 = vpop.f32.mrb[3].mxu0  ;;  %v213_v58 = vpop.f32.mrb[3].mxu1 }
  0xf9   :  { %v338_v61 = vmul.f32 %v265_v36, %v181_v57  ;;  %v346_v62 = vmul.f32 %v305_v41, %v213_v58 }
  0xfa   :  { %v505_v63 = vpack.c.bf16 %v340_v55, %v339_v53  ;;  %v525_v0 = vpack.c.bf16 %v348_v56, %v347_v54 }
  0xfb   :  { %v500_v1 = vpack.c.bf16 %v338_v61, %v337_v59  ;;  %v520_v2 = vpack.c.bf16 %v346_v62, %v345_v60 }
  0xfc   :  { %537 = vst [vmem:[#allocation2 + $0x8] sm:$0xff] %v505_v63   ;;  %541 = vst [vmem:[#allocation2 + $0x28] sm:$0xff] %v525_v0  }
  0xfd   :  { %501 = vst [vmem:[#allocation2] sm:$0xff] %v500_v1   ;;  %540 = vst [vmem:[#allocation2 + $0x20] sm:$0xff] %v520_v2   ;;  %v582_v5 = vpop.f32.mrb[4].mxu0  ;;  %v590_v6 = vpop.f32.mrb[4].mxu1 }
  0xfe   :  { %v194_v7 = vpop.f32.mrb[5].mxu0  ;;  %v226_v8 = vpop.f32.mrb[5].mxu1  ;;  %v343_v11 = vmul.f32 %v582_v5, %v290_v40  ;;  %v351_v12 = vmul.f32 %v590_v6, %v330_v4 }
  0xff   :  { %v583_v9 = vpop.f32.mrb[6].mxu0  ;;  %v591_v10 = vpop.f32.mrb[6].mxu1  ;;  %v341_v17 = vmul.f32 %v280_v38, %v194_v7  ;;  %v349_v18 = vmul.f32 %v320_v46, %v226_v8 }
 0x100   :  { %v344_v13 = vmul.f32 %v583_v9, %v295_v39  ;;  %v352_v14 = vmul.f32 %v591_v10, %v335_v3  ;;  %v197_v15 = vpop.f32.mrb[7].mxu0  ;;  %v229_v16 = vpop.f32.mrb[7].mxu1 }
 0x101   :  { %v342_v19 = vmul.f32 %v285_v37, %v197_v15  ;;  %v350_v20 = vmul.f32 %v325_v45, %v229_v16 }
 0x102   :  { %v515_v21 = vpack.c.bf16 %v344_v13, %v343_v11  ;;  %v535_v22 = vpack.c.bf16 %v352_v14, %v351_v12 }
 0x103   :  { %v510_v23 = vpack.c.bf16 %v342_v19, %v341_v17  ;;  %v530_v24 = vpack.c.bf16 %v350_v20, %v349_v18 }
 0x104   :  { %539 = vst [vmem:[#allocation2 + $0x18] sm:$0xff] %v515_v21   ;;  %543 = vst [vmem:[#allocation2 + $0x38] sm:$0xff] %v535_v22  }
 0x105   :  { %538 = vst [vmem:[#allocation2 + $0x10] sm:$0xff] %v510_v23   ;;  %542 = vst [vmem:[#allocation2 + $0x30] sm:$0xff] %v530_v24  }
 0x106   :  { %641 = shalt.err (!%p638_p4)
}
 0x107   :  { %s642_s23 = scalar_lea.hbm %s789_s3, 1024 }
 0x108   :  { %p643_p5 = scmp.ne.s32.totalorder %s789_s3, %s642_s23  ;;  %p646_p6 = scmp.lt.u32.totalorder %s642_s23, %s789_s3 }
 0x10a   :  { %p648_p7 = pnand %p646_p6, %p643_p5 }
 0x10c   :  { %651 = shalt.err (!%p648_p7)
}
 0x10d   :  { %s656_s28 = smov 64   ;;  %s657_s29 = smov 4  }
 0x10e   :  { %444 = dma.vmem_to_hbm [thread:$0]  %s439_s2, 1024, %s789_s3, [#allocation3], %s656_s28, %s656_s28, %s657_s29  }
 0x10f   :  { %652 = dma.done.wait [#allocation3], 1024  }
 0x110   :  { %653 = vsyncadd [#allocation3], 4294966272 }
 0x111   :  { %448 = vsyncpa [#allocation3], 1 }

</bundles_post_ra>
